<compile_context>
chip_gen: v7x
topology: tpu7x:2x2x1
jax: 0.10.0
libtpu: 0.0.40
codegen_flags: <defaults>
</compile_context>

<pallas_src>
import math
import functools

import jax
import jax.numpy as jnp
from jax.experimental import pallas as pl
from jax.experimental.pallas import tpu as pltpu


def _modulations_kernel(x_ref, w_ref, b_ref, out_ref):
    # x_ref  : (T, Cc)   f32 condition features
    # w_ref  : (Cc, N)   bf16 stacked (scale-folded) modulation weights
    # b_ref  : (1, N)    f32 stacked biases (lr_mul folded)
    # out_ref: (T, N)    f32
    x = x_ref[...].astype(w_ref.dtype)                       # bf16 MXU inputs
    acc = jnp.dot(x, w_ref[...], preferred_element_type=jnp.float32)
    out_ref[...] = (acc + b_ref[...]).astype(out_ref.dtype)


def pack_modulation_params(weights, biases, *, lr_mul=1.0):
    """One-time parameter packing (do this at load time, NOT per forward).

    weights: (M, Cs, Cc)  per-layer EqualLinear weights (out_dim, in_dim)
    biases : (M, Cs)      per-layer EqualLinear biases
    Returns:
      w_packed: (Cc, M*Cs) bf16, lane-dense, EqualLinear scale folded in
      b_packed: (1,  M*Cs) f32,  lr_mul folded in
    """
    M, Cs, Cc = weights.shape
    scale = (1.0 / math.sqrt(Cc)) * float(lr_mul)
    # w_packed[k, m*Cs + c] = weights[m, c, k] * scale
    w_packed = (jnp.transpose(weights, (2, 0, 1)).reshape(Cc, M * Cs)
                * scale).astype(jnp.bfloat16)
    b_packed = (biases.astype(jnp.float32) * float(lr_mul)).reshape(1, M * Cs)
    return w_packed, b_packed


@functools.partial(jax.jit, static_argnames=("n_block", "n_conv_each_block"))
def modulations_forward(condition_feature, w_packed, b_packed, *,
                        n_block=10, n_conv_each_block=2):
    """condition_feature: (T, Cc, 1, 1) f32.
       w_packed/b_packed: from pack_modulation_params.
       Returns (n_block, n_conv_each_block, T, 1, Cs, 1, 1) f32."""
    T, Cc, h, w = condition_feature.shape
    assert h == 1 and w == 1, "Modulations expects [task_size, C, 1, 1] input"
    M = n_block * n_conv_each_block
    Cc_w, N = w_packed.shape
    assert Cc_w == Cc and N % M == 0
    Cs = N // M

    # (T, Cc, 1, 1) -> (T, Cc); no transpose needed since h = w = 1.
    x = condition_feature.reshape(T, Cc).astype(jnp.float32)

    out2d = pl.pallas_call(
        _modulations_kernel,
        out_shape=jax.ShapeDtypeStruct((T, N), jnp.float32),
        grid=(1,),
        in_specs=[
            pl.BlockSpec((T, Cc), lambda i: (0, 0)),
            pl.BlockSpec((Cc, N), lambda i: (0, 0)),
            pl.BlockSpec((1, N), lambda i: (0, 0)),
        ],
        out_specs=pl.BlockSpec((T, N), lambda i: (0, 0)),
        compiler_params=pltpu.CompilerParams(
            dimension_semantics=("arbitrary",)),
    )(x, w_packed, b_packed)

    # (T, M*Cs) -> (M, T, Cs) -> (n_block, n_conv_each_block, T, 1, Cs, 1, 1)
    out = jnp.transpose(out2d.reshape(T, M, Cs), (1, 0, 2))
    return out.reshape(n_block, n_conv_each_block, T, 1, Cs, 1, 1)


def modulations_reference(condition_feature, weights, biases, *,
                          n_block=10, n_conv_each_block=2, lr_mul=1.0):
    """Pure-JAX f32 reference matching the PyTorch module's forward."""
    T, Cc, h, w = condition_feature.shape
    M, Cs, _ = weights.shape
    scale = (1.0 / math.sqrt(Cc)) * float(lr_mul)
    x = jnp.transpose(condition_feature, (0, 2, 3, 1)).reshape(T, -1)
    outs = []
    for m in range(M):
        y = x @ (weights[m] * scale).T + biases[m] * float(lr_mul)   # (T, Cs)
        outs.append(y.reshape(1, T, 1, Cs, 1, 1))
    out = jnp.concatenate(outs, 0)
    return out.reshape(n_block, n_conv_each_block, T, 1, Cs, 1, 1)


if __name__ == "__main__":
    # Module defaults: n_block=10, n_conv_each_block=2, conv_index='22'
    # (condition_channel=128), sr_in_channel=64.  Small task_size=2.
    n_block, n_conv_each_block = 10, 2
    M = n_block * n_conv_each_block
    T, Cc, Cs = 2, 128, 64

    key = jax.random.PRNGKey(0)
    kx, kw = jax.random.split(key, 2)

    # condition_feature: [task_size, 128, 1, 1]
    cond = jax.random.normal(kx, (T, Cc, 1, 1), dtype=jnp.float32)
    # EqualLinear init: weight ~ randn(out, in) / lr_mul; bias = full(bias_init=1).
    # (initialize_weights is a no-op here: EqualLinear holds raw nn.Parameters.)
    weights = jax.random.normal(kw, (M, Cs, Cc), dtype=jnp.float32)
    biases = jnp.ones((M, Cs), jnp.float32)

    # One-time packing (load-time), then the hot forward path.
    w_packed, b_packed = pack_modulation_params(weights, biases)

    out = modulations_forward(cond, w_packed, b_packed,
                              n_block=n_block,
                              n_conv_each_block=n_conv_each_block)
    out = jax.block_until_ready(out)

    ref = modulations_reference(cond, weights, biases,
                                n_block=n_block,
                                n_conv_each_block=n_conv_each_block)
    ref = jax.block_until_ready(ref)

    assert out.shape == (n_block, n_conv_each_block, T, 1, Cs, 1, 1)
    # bf16 weight/x quantization in the kernel -> loosen tolerance vs f32 ref.
    max_err = jnp.max(jnp.abs(out - ref))
    assert jnp.allclose(out, ref, rtol=3e-2, atol=3e-2), (
        f"max abs err {max_err}")

    print("KERNEL_OK")
</pallas_src>

<mosaic_0001>
module attributes {stable_mosaic.version = 11 : i64} {
  func.func @_modulations_kernel(%arg0: i32, %arg1: memref<2x128xf32, #tpu.memory_space<vmem>>, %arg2: memref<128x1280xbf16, #tpu.memory_space<vmem>>, %arg3: memref<1x1280xf32, #tpu.memory_space<vmem>>, %arg4: memref<2x1280xf32, #tpu.memory_space<vmem>>) attributes {dimension_semantics = [#tpu.dimension_semantics<arbitrary>], iteration_bounds = array<i64: 1>, scalar_prefetch = 0 : i64, scratch_operands = 0 : i64, tpu.core_type = #tpu.core_type<tc>, window_params = [{pipeline_mode = #tpu.pipeline_mode<synchronous>, transform_indices = @transform_0, window_bounds = array<i64: 2, 128>}, {pipeline_mode = #tpu.pipeline_mode<synchronous>, transform_indices = @transform_1, window_bounds = array<i64: 128, 1280>}, {pipeline_mode = #tpu.pipeline_mode<synchronous>, transform_indices = @transform_2, window_bounds = array<i64: 1, 1280>}, {pipeline_mode = #tpu.pipeline_mode<synchronous>, transform_indices = @transform_3, window_bounds = array<i64: 2, 1280>}]} {
    %c0 = arith.constant 0 : index
    %c0_0 = arith.constant 0 : index
    %0 = vector.load %arg1[%c0, %c0_0] : memref<2x128xf32, #tpu.memory_space<vmem>>, vector<2x128xf32>
    %1 = arith.truncf %0 : vector<2x128xf32> to vector<2x128xbf16>
    %c0_1 = arith.constant 0 : index
    %c0_2 = arith.constant 0 : index
    %2 = vector.load %arg2[%c0_1, %c0_2] : memref<128x1280xbf16, #tpu.memory_space<vmem>>, vector<128x1280xbf16>
    %cst = arith.constant dense<0.000000e+00> : vector<2x1280xf32>
    %3 = tpu.matmul %1, %2, %cst {dimension_numbers = #tpu.dot_dimension_numbers<[1], [0], [0], [1], [0, 0, 1, 1], [], []>} : vector<2x128xbf16>, vector<128x1280xbf16>, vector<2x1280xf32> -> vector<2x1280xf32>
    %c0_3 = arith.constant 0 : index
    %c0_4 = arith.constant 0 : index
    %4 = vector.load %arg3[%c0_3, %c0_4] : memref<1x1280xf32, #tpu.memory_space<vmem>>, vector<1x1280xf32>
    %5 = vector.broadcast %4 : vector<1x1280xf32> to vector<2x1280xf32>
    %6 = arith.addf %3, %5 : vector<2x1280xf32>
    %c0_5 = arith.constant 0 : index
    %c0_6 = arith.constant 0 : index
    %7 = vector.load %arg4[%c0_5, %c0_6] : memref<2x1280xf32, #tpu.memory_space<vmem>>, vector<2x1280xf32>
    tpu.vector_store %arg4[%c0_5, %c0_6], %6 {strides = array<i32>} : memref<2x1280xf32, #tpu.memory_space<vmem>>, vector<2x1280xf32>,
    return
  }
  func.func @transform_0(%arg0: i32) -> (i32, i32) {
    %c0_i32 = arith.constant 0 : i32
    %c0_i32_0 = arith.constant 0 : i32
    %c0_i32_1 = arith.constant 0 : i32
    return %c0_i32, %c0_i32_0 : i32, i32
  }
  func.func @transform_1(%arg0: i32) -> (i32, i32) {
    %c0_i32 = arith.constant 0 : i32
    %c0_i32_0 = arith.constant 0 : i32
    %c0_i32_1 = arith.constant 0 : i32
    return %c0_i32, %c0_i32_0 : i32, i32
  }
  func.func @transform_2(%arg0: i32) -> (i32, i32) {
    %c0_i32 = arith.constant 0 : i32
    %c0_i32_0 = arith.constant 0 : i32
    %c0_i32_1 = arith.constant 0 : i32
    return %c0_i32, %c0_i32_0 : i32, i32
  }
  func.func @transform_3(%arg0: i32) -> (i32, i32) {
    %c0_i32 = arith.constant 0 : i32
    %c0_i32_0 = arith.constant 0 : i32
    %c0_i32_1 = arith.constant 0 : i32
    return %c0_i32, %c0_i32_0 : i32, i32
  }
}

</mosaic_0001>

<bundles_post_ra>
// kernel: modulations_forward.1
= control target key start
LH: loop header
LB: loop body
LE: loop exit
PB: predicated region body
PF: predicated region fallthrough
CT: control target
= control target key end

     0   :  { %8 = vsyncpa [#allocation3], 0  ;;  %s1185_s0 = inlined_call_operand.hbm [shape: f32[2,128], index: 0, kind: input, shape index: {}]   ;;  %s1186_s1 = inlined_call_operand.hbm [shape: bf16[128,1280], index: 1, kind: input, shape index: {}]   ;;  %s1187_s2 = inlined_call_operand.vmem [shape: f32[1,1280], index: 2, kind: input, shape index: {}]   ;;  %s1188_s3 = inlined_call_operand.vmem [shape: f32[2,1280], index: 3, kind: output, shape index: {}]  }
   0x1   :  { %9 = vsyncpa [#allocation5], 0  ;;  %s1101_s12 = smov [#allocation2]   ;;  %s1102_s14 = smov [#allocation4]  }
   0x2   :  { %s16_s13 = sshll.u32 %s1101_s12, 4  ;;  %s25_s15 = sshll.u32 %s1102_s14, 4  ;;  %s17_s13 = int_to_ptr.vmem [resolvable:$true] %s16_s13  ;;  %s1127_s15 = int_to_ptr.vmem [resolvable:$true] %s25_s15 }
   0x3   :  { %s1053_s18 = scalar_lea.hbm %s1185_s0, 32 }
   0x4   :  { %p1054_p0 = scmp.ne.s32.totalorder %s1185_s0, %s1053_s18  ;;  %p1057_p1 = scmp.lt.u32.totalorder %s1053_s18, %s1185_s0 }
   0x6   :  { %p1059_p2 = pnand %p1057_p1, %p1054_p0 }
   0x8   :  { %1062 = shalt.err (!%p1059_p2)
}
   0x9   :  { %s1063_s23 = scalar_lea.vmem %s17_s13, 32  ;;  %p1068_p4 = scmp.lt.s32.totalorder %s17_s13, %s17_s13 }
   0xa   :  { %p1064_p3 = scmp.ne.s32.totalorder %s17_s13, %s1063_s23  ;;  %p1069_p5 = scmp.lt.s32.totalorder %s1063_s23, %s1063_s23 }
   0xc   :  { %p1070_p6 = por %p1069_p5, %p1068_p4 }
   0xe   :  { %p1071_p7 = pnand %p1070_p6, %p1064_p3 }
  0x10   :  { %1074 = shalt.err (!%p1071_p7)
}
  0x11   :  { %19 = dma.hbm_to_vmem [thread:$0]  %s1185_s0, 32, %s17_s13, [#allocation3]  }
  0x12   :  { %s1075_s28 = scalar_lea.hbm %s1186_s1, 10240 }
  0x13   :  { %p1076_p8 = scmp.ne.s32.totalorder %s1186_s1, %s1075_s28  ;;  %p1079_p9 = scmp.lt.u32.totalorder %s1075_s28, %s1186_s1 }
  0x15   :  { %p1081_p10 = pnand %p1079_p9, %p1076_p8 }
  0x17   :  { %1084 = shalt.err (!%p1081_p10)
}
  0x18   :  { %s1085_s6 = scalar_lea.vmem %s1127_s15, 10240  ;;  %p1090_p12 = scmp.lt.s32.totalorder %s1127_s15, %s1127_s15 }
  0x19   :  { %p1086_p11 = scmp.ne.s32.totalorder %s1127_s15, %s1085_s6  ;;  %p1091_p13 = scmp.lt.s32.totalorder %s1085_s6, %s1085_s6 }
  0x1b   :  { %p1092_p0 = por %p1091_p13, %p1090_p12 }
  0x1d   :  { %p1093_p1 = pnand %p1092_p0, %p1086_p11 }
  0x1f   :  { %1096 = shalt.err (!%p1093_p1)
}
  0x20   :  { %s1103_s0 = smov 640   ;;  %s1104_s7 = smov 40  }
  0x21   :  { %31 = dma.hbm_to_vmem [thread:$0]  %s1186_s1, 10240, %s1127_s15, [#allocation5], %s1103_s0, %s1103_s0, %s1104_s7  }
  0x22   :  { %1097 = dma.done.wait [#allocation3], 32  }
  0x23   :  { %1098 = vsyncadd [#allocation3], 4294967264 }
  0x24   :  { %1099 = dma.done.wait [#allocation5], 10240  }
  0x25   :  { %1100 = vsyncadd [#allocation5], 4294957056  ;;  %v1105_v0 = vmov 0   ;;  %v933_v1 = vld [vmem:[#allocation4 + $0x4] ss:$40 sps:$4 sm:$0xff]  }
  0x26   :  { %609 = vmatprep.mubr.bf16.mxu0 %v1105_v0  ;;  %650 = vmatprep.mubr.bf16.mxu1 %v1105_v0  ;;  %v935_v2 = vld [vmem:[#allocation4 + $0xc] ss:$40 sps:$4 sm:$0xff]   ;;  %v937_v3 = vld [vmem:[#allocation4] ss:$40 sps:$4 sm:$0xff]   ;;  %v941_v6 = vld [vmem:[#allocation4 + $0x5c] ss:$40 sps:$4 sm:$0xff]  }
  0x27   :  { %577 = vmatprep.subr.bf16.mxu0 %v933_v1  ;;  %v938_v4 = vld [vmem:[#allocation4 + $0x8] ss:$40 sps:$4 sm:$0xff]   ;;  %618 = vmatprep.subr.bf16.mxu1 %v935_v2  ;;  %v939_v5 = vld [vmem:[#allocation4 + $0x54] ss:$40 sps:$4 sm:$0xff]   ;;  %v944_v8 = vld [vmem:[#allocation4 + $0x58] ss:$40 sps:$4 sm:$0xff]  }
  0x28   :  { %578 = vmatpush1.bf16.msra.mxu0 %v937_v3  ;;  %619 = vmatpush1.bf16.msra.mxu1 %v938_v4  ;;  %v943_v7 = vld [vmem:[#allocation4 + $0x50] ss:$40 sps:$4 sm:$0xff]   ;;  %v945_v9 = vld [vmem:[#allocation4 + $0xa4] ss:$40 sps:$4 sm:$0xff]   ;;  %v949_v11 = vld [vmem:[#allocation4 + $0xa0] ss:$40 sps:$4 sm:$0xff]  }
  0x29   :  { %579 = vmatprep.subr.bf16.mxu0 %v939_v5  ;;  %620 = vmatprep.subr.bf16.mxu1 %v941_v6  ;;  %v947_v10 = vld [vmem:[#allocation4 + $0xac] ss:$40 sps:$4 sm:$0xff]   ;;  %v950_v12 = vld [vmem:[#allocation4 + $0xa8] ss:$40 sps:$4 sm:$0xff]   ;;  %v953_v14 = vld [vmem:[#allocation4 + $0xfc] ss:$40 sps:$4 sm:$0xff]  }
  0x2a   :  { %v951_v13 = vld [vmem:[#allocation4 + $0xf4] ss:$40 sps:$4 sm:$0xff]   ;;  %v955_v15 = vld [vmem:[#allocation4 + $0xf0] ss:$40 sps:$4 sm:$0xff]   ;;  %v957_v17 = vld [vmem:[#allocation4 + $0x144] ss:$40 sps:$4 sm:$0xff]  }
  0x2b   :  { %v956_v16 = vld [vmem:[#allocation4 + $0xf8] ss:$40 sps:$4 sm:$0xff]   ;;  %v959_v18 = vld [vmem:[#allocation4 + $0x14c] ss:$40 sps:$4 sm:$0xff]   ;;  %v962_v20 = vld [vmem:[#allocation4 + $0x148] ss:$40 sps:$4 sm:$0xff]  }
  0x2c   :  { %580 = vmatpush1.bf16.msra.mxu0 %v943_v7  ;;  %621 = vmatpush1.bf16.msra.mxu1 %v944_v8  ;;  %v961_v19 = vld [vmem:[#allocation4 + $0x140] ss:$40 sps:$4 sm:$0xff]   ;;  %v963_v21 = vld [vmem:[#allocation4 + $0x194] ss:$40 sps:$4 sm:$0xff]   ;;  %v967_v23 = vld [vmem:[#allocation4 + $0x190] ss:$40 sps:$4 sm:$0xff]  }
  0x2d   :  { %581 = vmatprep.subr.bf16.mxu0 %v945_v9  ;;  %622 = vmatprep.subr.bf16.mxu1 %v947_v10  ;;  %v965_v22 = vld [vmem:[#allocation4 + $0x19c] ss:$40 sps:$4 sm:$0xff]   ;;  %v968_v24 = vld [vmem:[#allocation4 + $0x198] ss:$40 sps:$4 sm:$0xff]   ;;  %v971_v26 = vld [vmem:[#allocation4 + $0x1ec] ss:$40 sps:$4 sm:$0xff]  }
  0x2e   :  { %v969_v25 = vld [vmem:[#allocation4 + $0x1e4] ss:$40 sps:$4 sm:$0xff]   ;;  %v973_v27 = vld [vmem:[#allocation4 + $0x1e0] ss:$40 sps:$4 sm:$0xff]   ;;  %v975_v29 = vld [vmem:[#allocation4 + $0x234] ss:$40 sps:$4 sm:$0xff]  }
  0x2f   :  { %v974_v28 = vld [vmem:[#allocation4 + $0x1e8] ss:$40 sps:$4 sm:$0xff]   ;;  %v977_v30 = vld [vmem:[#allocation4 + $0x23c] ss:$40 sps:$4 sm:$0xff]   ;;  %v980_v32 = vld [vmem:[#allocation4 + $0x238] ss:$40 sps:$4 sm:$0xff]  }
  0x30   :  { %582 = vmatpush1.bf16.msra.mxu0 %v949_v11  ;;  %623 = vmatpush1.bf16.msra.mxu1 %v950_v12  ;;  %v979_v31 = vld [vmem:[#allocation4 + $0x230] ss:$40 sps:$4 sm:$0xff]   ;;  %v41_v33 = vld [vmem:[#allocation2] sm:$0x3]  ;;  %v989_v39 = vld [vmem:[#allocation4 + $0x64] ss:$40 sps:$4 sm:$0xff]  }
  0x31   :  { %583 = vmatprep.subr.bf16.mxu0 %v951_v13  ;;  %624 = vmatprep.subr.bf16.mxu1 %v953_v14  ;;  %v983_v34 = vld [vmem:[#allocation4 + $0x14] ss:$40 sps:$4 sm:$0xff]   ;;  %v1160_v36 = vpack.c.bf16 %v41_v33, %v41_v33  ;;  %v981_v37 = vld [vmem:[#allocation4 + $0x10] ss:$40 sps:$4 sm:$0xff]   ;;  %v987_v41 = vld [vmem:[#allocation4 + $0x60] ss:$40 sps:$4 sm:$0xff]  }
  0x32   :  { %v986_v35 = vld [vmem:[#allocation4 + $0x1c] ss:$40 sps:$4 sm:$0xff]   ;;  %v984_v38 = vld [vmem:[#allocation4 + $0x18] ss:$40 sps:$4 sm:$0xff]   ;;  %v992_v40 = vld [vmem:[#allocation4 + $0x6c] ss:$40 sps:$4 sm:$0xff]  }
  0x33   :  { %v990_v42 = vld [vmem:[#allocation4 + $0x68] ss:$40 sps:$4 sm:$0xff]   ;;  %v995_v43 = vld [vmem:[#allocation4 + $0xb4] ss:$40 sps:$4 sm:$0xff]   ;;  %v996_v46 = vld [vmem:[#allocation4 + $0xb8] ss:$40 sps:$4 sm:$0xff]  }
  0x34   :  { %584 = vmatpush1.bf16.msra.mxu0 %v955_v15  ;;  %625 = vmatpush1.bf16.msra.mxu1 %v956_v16  ;;  %v998_v44 = vld [vmem:[#allocation4 + $0xbc] ss:$40 sps:$4 sm:$0xff]   ;;  %v993_v45 = vld [vmem:[#allocation4 + $0xb0] ss:$40 sps:$4 sm:$0xff]   ;;  %v1004_v48 = vld [vmem:[#allocation4 + $0x10c] ss:$40 sps:$4 sm:$0xff]  }
  0x35   :  { %585 = vmatprep.subr.bf16.mxu0 %v957_v17  ;;  %626 = vmatprep.subr.bf16.mxu1 %v959_v18  ;;  %v1001_v47 = vld [vmem:[#allocation4 + $0x104] ss:$40 sps:$4 sm:$0xff]   ;;  %v999_v49 = vld [vmem:[#allocation4 + $0x100] ss:$40 sps:$4 sm:$0xff]   ;;  %v1007_v51 = vld [vmem:[#allocation4 + $0x154] ss:$40 sps:$4 sm:$0xff]  }
  0x36   :  { %v1002_v50 = vld [vmem:[#allocation4 + $0x108] ss:$40 sps:$4 sm:$0xff]   ;;  %v1010_v52 = vld [vmem:[#allocation4 + $0x15c] ss:$40 sps:$4 sm:$0xff]   ;;  %v1008_v54 = vld [vmem:[#allocation4 + $0x158] ss:$40 sps:$4 sm:$0xff]  }
  0x37   :  { %v1005_v53 = vld [vmem:[#allocation4 + $0x150] ss:$40 sps:$4 sm:$0xff]   ;;  %v1013_v55 = vld [vmem:[#allocation4 + $0x1a4] ss:$40 sps:$4 sm:$0xff]   ;;  %v1011_v57 = vld [vmem:[#allocation4 + $0x1a0] ss:$40 sps:$4 sm:$0xff]  }
  0x38   :  { %586 = vmatpush1.bf16.msra.mxu0 %v961_v19  ;;  %627 = vmatpush1.bf16.msra.mxu1 %v962_v20  ;;  %v1016_v56 = vld [vmem:[#allocation4 + $0x1ac] ss:$40 sps:$4 sm:$0xff]   ;;  %v1014_v58 = vld [vmem:[#allocation4 + $0x1a8] ss:$40 sps:$4 sm:$0xff]   ;;  %v1022_v60 = vld [vmem:[#allocation4 + $0x1fc] ss:$40 sps:$4 sm:$0xff]   ;;  %v127_v19 = vlaneseq }
  0x39   :  { %587 = vmatprep.subr.bf16.mxu0 %v963_v21  ;;  %628 = vmatprep.subr.bf16.mxu1 %v965_v22  ;;  %v1019_v59 = vld [vmem:[#allocation4 + $0x1f4] ss:$40 sps:$4 sm:$0xff]   ;;  %v1017_v61 = vld [vmem:[#allocation4 + $0x1f0] ss:$40 sps:$4 sm:$0xff]   ;;  %v1025_v63 = vld [vmem:[#allocation4 + $0x244] ss:$40 sps:$4 sm:$0xff]  }
  0x3a   :  { %v1020_v62 = vld [vmem:[#allocation4 + $0x1f8] ss:$40 sps:$4 sm:$0xff]   ;;  %v1028_v1 = vld [vmem:[#allocation4 + $0x24c] ss:$40 sps:$4 sm:$0xff]   ;;  %v1026_v3 = vld [vmem:[#allocation4 + $0x248] ss:$40 sps:$4 sm:$0xff]  }
  0x3b   :  { %v1023_v2 = vld [vmem:[#allocation4 + $0x240] ss:$40 sps:$4 sm:$0xff]   ;;  %v1031_v4 = vld [vmem:[#allocation4 + $0x24] ss:$40 sps:$4 sm:$0xff]   ;;  %v1034_v6 = vld [vmem:[#allocation4 + $0x74] ss:$40 sps:$4 sm:$0xff]  }
  0x3c   :  { %588 = vmatpush1.bf16.msra.mxu0 %v967_v23  ;;  %629 = vmatpush1.bf16.msra.mxu1 %v968_v24  ;;  %v1029_v5 = vld [vmem:[#allocation4 + $0x20] ss:$40 sps:$4 sm:$0xff]   ;;  %v1032_v7 = vld [vmem:[#allocation4 + $0x70] ss:$40 sps:$4 sm:$0xff]   ;;  %v1037_v8 = vld [vmem:[#allocation4 + $0xc4] ss:$40 sps:$4 sm:$0xff]  }
  0x3d   :  { %589 = vmatprep.subr.bf16.mxu0 %v969_v25  ;;  %630 = vmatprep.subr.bf16.mxu1 %v971_v26  ;;  %v1035_v9 = vld [vmem:[#allocation4 + $0xc0] ss:$40 sps:$4 sm:$0xff]   ;;  %v1040_v10 = vld [vmem:[#allocation4 + $0x114] ss:$40 sps:$4 sm:$0xff]   ;;  %v1038_v11 = vld [vmem:[#allocation4 + $0x110] ss:$40 sps:$4 sm:$0xff]  }
  0x3e   :  { %v1043_v12 = vld [vmem:[#allocation4 + $0x164] ss:$40 sps:$4 sm:$0xff]   ;;  %v1041_v13 = vld [vmem:[#allocation4 + $0x160] ss:$40 sps:$4 sm:$0xff]   ;;  %v1046_v14 = vld [vmem:[#allocation4 + $0x1b4] ss:$40 sps:$4 sm:$0xff]  }
  0x3f   :  { %v1044_v15 = vld [vmem:[#allocation4 + $0x1b0] ss:$40 sps:$4 sm:$0xff]   ;;  %v1049_v16 = vld [vmem:[#allocation4 + $0x204] ss:$40 sps:$4 sm:$0xff]   ;;  %v1052_v17 = vld [vmem:[#allocation4 + $0x254] ss:$40 sps:$4 sm:$0xff]  }
  0x40   :  { %590 = vmatpush1.bf16.msra.mxu0 %v973_v27  ;;  %631 = vmatpush1.bf16.msra.mxu1 %v974_v28  ;;  %v1050_v18 = vld [vmem:[#allocation4 + $0x250] ss:$40 sps:$4 sm:$0xff]   ;;  %v128_v20 = vshrl.u32 %v127_v19, 7  ;;  %v123_v23 = vld [vmem:[%s1187_s2] sm:$0xff]  ;;  %v1106_v25 = vmov 1983009808  }
  0x41   :  { %591 = vmatprep.subr.bf16.mxu0 %v975_v29  ;;  %632 = vmatprep.subr.bf16.mxu1 %v977_v30  ;;  %v795_v26 = vunpack.c.l.s4 %v1106_v25 }
  0x42   :  { %v129_v21 = vsub.s32 0, %v128_v20  ;;  %v137_v22 = vsub.s32 2, %v128_v20  ;;  %v133_v24 = vsub.s32 1, %v128_v20  ;;  %v141_v27 = vsub.s32 3, %v128_v20 }
  0x44   :  { %592 = vmatpush1.bf16.msra.mxu0 %v979_v31  ;;  %633 = vmatpush1.bf16.msra.mxu1 %v980_v32  ;;  %v130_v28 = vrot.slane %v123_v23, %v129_v21  ;;  %v138_v29 = vrot.slane %v123_v23, %v137_v22  ;;  %v134_v30 = vrot.slane %v123_v23, %v133_v24  ;;  %v796_v31 = vunpack.c.0.s8 %v795_v26 }
  0x45   :  { %659 = vmatprep.subr.bf16.mxu0 %v983_v34  ;;  %700 = vmatprep.subr.bf16.mxu1 %v986_v35  ;;  %v142_v32 = vrot.slane %v123_v23, %v141_v27 }
  0x47   :  { %610 = vmatmul.mubr.bf16.vlgmr.msra.gmra.mrb[0].mxu0 %v1160_v36  ;;  %651 = vmatmul.mubr.bf16.vlgmr.msra.gmra.mrb[0].mxu1 %v1160_v36 }
  0x48   :  { %660 = vmatpush1.bf16.msra.mxu0 %v981_v37  ;;  %701 = vmatpush1.bf16.msra.mxu1 %v984_v38 }
  0x49   :  { %661 = vmatprep.subr.bf16.mxu0 %v989_v39  ;;  %702 = vmatprep.subr.bf16.mxu1 %v992_v40  ;;  %v799_v40 = vsub.s32 %v796_v31, %v128_v20 }
  0x4a   :  { %691 = vmatprep.mubr.bf16.mxu0 %v1105_v0  ;;  %732 = vmatprep.mubr.bf16.mxu1 %v1105_v0 }
  0x4c   :  { %662 = vmatpush1.bf16.msra.mxu0 %v987_v41  ;;  %703 = vmatpush1.bf16.msra.mxu1 %v990_v42 }
  0x4d   :  { %663 = vmatprep.subr.bf16.mxu0 %v995_v43  ;;  %704 = vmatprep.subr.bf16.mxu1 %v998_v44 }
  0x50   :  { %664 = vmatpush1.bf16.msra.mxu0 %v993_v45  ;;  %705 = vmatpush1.bf16.msra.mxu1 %v996_v46 }
  0x51   :  { %665 = vmatprep.subr.bf16.mxu0 %v1001_v47  ;;  %706 = vmatprep.subr.bf16.mxu1 %v1004_v48 }
  0x54   :  { %666 = vmatpush1.bf16.msra.mxu0 %v999_v49  ;;  %707 = vmatpush1.bf16.msra.mxu1 %v1002_v50 }
  0x55   :  { %667 = vmatprep.subr.bf16.mxu0 %v1007_v51  ;;  %708 = vmatprep.subr.bf16.mxu1 %v1010_v52  ;;  %v145_v51 = vsub.s32 4, %v128_v20  ;;  %v153_v52 = vsub.s32 6, %v128_v20 }
  0x58   :  { %668 = vmatpush1.bf16.msra.mxu0 %v1005_v53  ;;  %709 = vmatpush1.bf16.msra.mxu1 %v1008_v54  ;;  %v149_v53 = vsub.s32 5, %v128_v20  ;;  %v157_v54 = vsub.s32 7, %v128_v20 }
  0x59   :  { %669 = vmatprep.subr.bf16.mxu0 %v1013_v55  ;;  %710 = vmatprep.subr.bf16.mxu1 %v1016_v56  ;;  %v146_v55 = vrot.slane %v123_v23, %v145_v51  ;;  %v154_v56 = vrot.slane %v123_v23, %v153_v52 }
  0x5c   :  { %670 = vmatpush1.bf16.msra.mxu0 %v1011_v57  ;;  %711 = vmatpush1.bf16.msra.mxu1 %v1014_v58  ;;  %v150_v57 = vrot.slane %v123_v23, %v149_v53  ;;  %v158_v58 = vrot.slane %v123_v23, %v157_v54 }
  0x5d   :  { %671 = vmatprep.subr.bf16.mxu0 %v1019_v59  ;;  %712 = vmatprep.subr.bf16.mxu1 %v1022_v60 }
  0x60   :  { %672 = vmatpush1.bf16.msra.mxu0 %v1017_v61  ;;  %713 = vmatpush1.bf16.msra.mxu1 %v1020_v62 }
  0x61   :  { %673 = vmatprep.subr.bf16.mxu0 %v1025_v63  ;;  %714 = vmatprep.subr.bf16.mxu1 %v1028_v1 }
  0x64   :  { %674 = vmatpush1.bf16.msra.mxu0 %v1023_v2  ;;  %715 = vmatpush1.bf16.msra.mxu1 %v1026_v3 }
  0x65   :  { %741 = vmatprep.subr.bf16.mxu0 %v1031_v4 }
  0x67   :  { %692 = vmatmul.mubr.bf16.vlgmr.msra.gmra.mrb[4].mxu0 %v1160_v36  ;;  %733 = vmatmul.mubr.bf16.vlgmr.msra.gmra.mrb[4].mxu1 %v1160_v36 }
  0x68   :  { %742 = vmatpush1.bf16.msra.mxu0 %v1029_v5  ;;  %773 = vmatprep.mubr.bf16.mxu0 %v1105_v0  ;;  %v1047_v0 = vld [vmem:[#allocation4 + $0x200] ss:$40 sps:$4 sm:$0xff]  }
  0x69   :  { %743 = vmatprep.subr.bf16.mxu0 %v1034_v6 }
  0x6c   :  { %744 = vmatpush1.bf16.msra.mxu0 %v1032_v7 }
  0x6d   :  { %745 = vmatprep.subr.bf16.mxu0 %v1037_v8 }
  0x70   :  { %746 = vmatpush1.bf16.msra.mxu0 %v1035_v9 }
  0x71   :  { %747 = vmatprep.subr.bf16.mxu0 %v1040_v10 }
  0x74   :  { %748 = vmatpush1.bf16.msra.mxu0 %v1038_v11 }
  0x75   :  { %749 = vmatprep.subr.bf16.mxu0 %v1043_v12 }
  0x78   :  { %750 = vmatpush1.bf16.msra.mxu0 %v1041_v13  ;;  %v124_v13 = vld [vmem:[%s1187_s2 + $0x8] sm:$0x3] }
  0x79   :  { %751 = vmatprep.subr.bf16.mxu0 %v1046_v14  ;;  %v162_v14 = vrot.slane %v124_v13, %v129_v21 }
  0x7c   :  { %752 = vmatpush1.bf16.msra.mxu0 %v1044_v15  ;;  %v166_v15 = vrot.slane %v124_v13, %v133_v24 }
  0x7d   :  { %753 = vmatprep.subr.bf16.mxu0 %v1049_v16 }
  0x80   :  { %754 = vmatpush1.bf16.msra.mxu0 %v1047_v0 }
  0x81   :  { %755 = vmatprep.subr.bf16.mxu0 %v1052_v17 }
  0x84   :  { %756 = vmatpush1.bf16.msra.mxu0 %v1050_v18 }
  0x87   :  { %774 = vmatmul.mubr.bf16.vlgmr.msra.gmra.mrb[8].mxu0 %v1160_v36 }
 0x11a   :  { %v611_v33 = vpop.f32.mrb[0].mxu0  ;;  %v652_v34 = vpop.f32.mrb[0].mxu1 }
 0x11b   :  { %v612_v35 = vadd.f32 %v611_v33, %v130_v28  ;;  %v653_v36 = vadd.f32 %v652_v34, %v138_v29  ;;  %v613_v37 = vpop.f32.mrb[1].mxu0  ;;  %v654_v38 = vpop.f32.mrb[1].mxu1 }
 0x11c   :  { %v614_v39 = vadd.f32 %v613_v37, %v134_v30  ;;  %v655_v41 = vadd.f32 %v654_v38, %v142_v32  ;;  %v615_v42 = vpop.f32.mrb[2].mxu0  ;;  %v656_v43 = vpop.f32.mrb[2].mxu1 }
 0x11d   :  { %v616_v44 = vpop.f32.mrb[3].mxu0  ;;  %v657_v45 = vpop.f32.mrb[3].mxu1 }
 0x11e   :  { %v792_v46 = vcombine.low %v612_v35, %v614_v39  ;;  %v793_v47 = vcombine.low %v653_v36, %v655_v41 }
 0x120   :  { %v800_v48 = vrot.slane %v792_v46, %v799_v40  ;;  %v807_v49 = vrot.slane %v793_v47, %v799_v40 }
 0x122   :  { %v808_v50 = vcombine.low %v800_v48, %v807_v49 }
 0x124   :  { %837 = vst [vmem:[%s1188_s3] sm:$0xff] %v808_v50 }
 0x13a   :  { %v693_v59 = vpop.f32.mrb[4].mxu0  ;;  %v734_v60 = vpop.f32.mrb[4].mxu1 }
 0x13b   :  { %v694_v61 = vadd.f32 %v693_v59, %v146_v55  ;;  %v735_v62 = vadd.f32 %v734_v60, %v154_v56  ;;  %v695_v63 = vpop.f32.mrb[5].mxu0  ;;  %v736_v1 = vpop.f32.mrb[5].mxu1 }
 0x13c   :  { %v696_v2 = vadd.f32 %v695_v63, %v150_v57  ;;  %v737_v3 = vadd.f32 %v736_v1, %v158_v58  ;;  %v697_v4 = vpop.f32.mrb[6].mxu0  ;;  %v738_v5 = vpop.f32.mrb[6].mxu1 }
 0x13d   :  { %v698_v6 = vpop.f32.mrb[7].mxu0  ;;  %v739_v7 = vpop.f32.mrb[7].mxu1 }
 0x13e   :  { %v809_v8 = vcombine.low %v694_v61, %v696_v2  ;;  %v810_v9 = vcombine.low %v735_v62, %v737_v3 }
 0x140   :  { %v817_v10 = vrot.slane %v809_v8, %v799_v40  ;;  %v824_v11 = vrot.slane %v810_v9, %v799_v40 }
 0x142   :  { %v825_v12 = vcombine.low %v817_v10, %v824_v11 }
 0x144   :  { %838 = vst [vmem:[%s1188_s3 + $0x8] sm:$0xff] %v825_v12 }
 0x15a   :  { %v775_v16 = vpop.f32.mrb[8].mxu0 }
 0x15b   :  { %v776_v0 = vadd.f32 %v775_v16, %v162_v14  ;;  %v777_v17 = vpop.f32.mrb[9].mxu0 }
 0x15c   :  { %v778_v18 = vadd.f32 %v777_v17, %v166_v15  ;;  %v779_v19 = vpop.f32.mrb[10].mxu0 }
 0x15d   :  { %v780_v20 = vpop.f32.mrb[11].mxu0 }
 0x15e   :  { %v826_v22 = vcombine.low %v776_v0, %v778_v18 }
 0x160   :  { %926 = vst.sshfl [vmem:[%s1188_s3 + $0x10] sm:$0x33 pattern:$0x76325410] %v826_v22 }
 0x161   :  { %844 = vsyncpa [#allocation3], 1 }
 0x162   :  { %845 = vsyncpa [#allocation5], 1 }

</bundles_post_ra>
